<compile_context>
chip_gen: v5e
topology: v5e:2x2
jax: 0.10.0
libtpu: 0.0.40
codegen_flags: <defaults>
</compile_context>

<pallas_src>
import jax
import jax.numpy as jnp
from jax.experimental import pallas as pl
from jax.experimental.pallas import tpu as pltpu


def _pick_tile(s_total, c, itemsize):
    """Largest multiple-of-128 spatial tile under a conservative VMEM budget."""
    # Two double-buffered (C, TILE_S) input tiles under ~8 MiB; cap at 4096
    # (conservative end of the reviewed 4096-8192 range, so the full-tile
    # softmax intermediates stay modest without strip-mining -- revisit with a
    # fori_loop strip-mine if a bundle dump ever shows vld/vst saturation).
    budget = 8 * 1024 * 1024
    cap = (budget // (2 * 2 * c * itemsize)) // 128 * 128
    cap = max(128, min(cap, 4096))
    if s_total <= 128:
        return s_total                      # full-dim block, always legal
    if s_total <= cap and s_total % 128 == 0:
        return s_total
    return min(cap, (s_total // 128) * 128)


def mkldnn_fcl_forward(x_ncthw, weight, bias, *, tile_s=None, spatial_splits=None):
    """Eval-mode forward of MkldnnFullyConvolutionalLinear (softmax head).

    x_ncthw: (N, C, T, H, W)   (pass bf16 here for ~2x HBM savings if desired)
    weight:  (num_classes, C)  -- PyTorch nn.Linear convention
    bias:    (num_classes,)
    returns: (N, num_classes), dtype of x
    """
    n, c, t, h, w = x_ncthw.shape
    k = weight.shape[0]
    s_total = t * h * w

    # Free reshape: T, H, W are already trailing contiguous axes.  The PyTorch
    # permute is realized implicitly by the transposed matmul in the kernel.
    x_ncs = x_ncthw.reshape(n, c, s_total)
    w_in = weight.astype(x_ncs.dtype)            # tiny; matmul accumulates f32
    b_col = bias.astype(jnp.float32).reshape(k, 1)

    if tile_s is None:
        tile_s = _pick_tile(s_total, c, x_ncs.dtype.itemsize)
    tile_s = min(tile_s, s_total)
    assert tile_s % 128 == 0 or tile_s == s_total, (
        "tile_s must be a multiple of 128 or the full spatial extent")

    n_tiles = pl.cdiv(s_total, tile_s)

    if spatial_splits is None:
        # Keep both v7x TensorCores busy when the batch is tiny (no effect on
        # single-TC v5e/v6e, harmless there).
        spatial_splits = 2 if (n < 4 and n_tiles >= 2) else 1
    n_outer = max(1, min(spatial_splits, n_tiles))
    n_inner = pl.cdiv(n_tiles, n_outer)

    # Mask is needed if the last tile is partial, or if the outer split rounds
    # the tile count up (clamped duplicate tiles must contribute zero).
    needs_mask = (s_total % tile_s != 0) or (n_outer * n_inner > n_tiles)

    lane_width = 128 if tile_s % 128 == 0 else tile_s
    n_slabs = tile_s // lane_width
    last_tile = n_tiles - 1

    def kernel(x_ref, w_ref, b_ref, o_ref):
        # x_ref: (C, TILE_S)      spatial axis lane-dense
        # w_ref: (K, C)           resident projection weight
        # b_ref: (K, 1)           resident bias
        # o_ref: (K, lane_width)  lane-dense prob-sum accumulator / output
        si = pl.program_id(2)

        @pl.when(si == 0)
        def _init():
            o_ref[...] = jnp.zeros_like(o_ref)

        # Linear (transposed): (K, C) @ (C, TILE_S) -> (K, TILE_S), f32 acc.
        logits = jnp.dot(w_ref[...], x_ref[...],
                         preferred_element_type=jnp.float32)
        logits = logits + b_ref[...]                 # bias broadcast over lanes

        # Softmax over the class axis (axis 0 == PyTorch dim=4), in f32.
        m = jnp.max(logits, axis=0, keepdims=True)
        e = jnp.exp(logits - m)
        denom = jnp.sum(e, axis=0, keepdims=True)
        # Exact reciprocal (still EUP, ~free in this HBM-bound kernel).
        # approx=True is a free knob if ~1e-3 softmax error is acceptable.
        probs = e * pl.reciprocal(denom, approx=False)

        if needs_mask:
            # Zero padded / out-of-range columns; their softmax still sums to 1
            # per column and would otherwise bias the mean.
            g = pl.program_id(1) * pl.num_programs(2) + si
            valid = s_total - g * tile_s
            col = jax.lax.broadcasted_iota(jnp.int32, (1, tile_s), 1)
            probs = jnp.where(col < valid, probs, jnp.float32(0.0))

        # Fold TILE_S/128 lane slabs with plain VPU adds (no XLU lane reduce,
        # lane-dense accumulator -> unmasked stores).
        part = probs[:, 0:lane_width]
        for j in range(1, n_slabs):
            part = part + probs[:, j * lane_width:(j + 1) * lane_width]
        o_ref[...] += part

    def x_index_map(i, so, si):
        g = so * n_inner + si
        # Clamp so a rounded-up outer split never DMAs past the array; those
        # duplicate tiles are fully masked in the kernel.
        return (i, 0, jnp.minimum(g, last_tile))

    cost = pl.CostEstimate(
        flops=2 * n * s_total * k * c,
        transcendentals=n * s_total * k,
        bytes_accessed=(x_ncs.size * x_ncs.dtype.itemsize
                        + w_in.size * w_in.dtype.itemsize
                        + b_col.size * 4
                        + n * n_outer * k * lane_width * 4),
    )

    partial = pl.pallas_call(
        kernel,
        out_shape=jax.ShapeDtypeStruct((n, n_outer, k, lane_width), jnp.float32),
        grid_spec=pltpu.PrefetchScalarGridSpec(
            num_scalar_prefetch=0,
            grid=(n, n_outer, n_inner),
            in_specs=[
                # x: (N, C, S) -> (C, TILE_S) tiles, spatial axis lane-dense.
                # (pipeline_mode=pl.Buffered(3) is an optional knob here if a
                #  long inner grid ever shows exposed DMA; default 2 is fine.)
                pl.BlockSpec((pl.Squeezed(), c, tile_s), x_index_map),
                # weight / bias: tiny, resident across the whole grid.
                pl.BlockSpec((k, c), lambda i, so, si: (0, 0)),
                pl.BlockSpec((k, 1), lambda i, so, si: (0, 0)),
            ],
            out_specs=pl.BlockSpec(
                (pl.Squeezed(), pl.Squeezed(), k, lane_width),
                lambda i, so, si: (i, so, 0, 0),
            ),
        ),
        compiler_params=pltpu.CompilerParams(
            dimension_semantics=("parallel", "parallel", "arbitrary"),
        ),
        cost_estimate=cost,
    )(x_ncs, w_in, b_col)

    # Tiny finalize: combine outer splits + the 128 accumulator lanes, then
    # divide by the true spatial size for the mean.
    out = partial.sum(axis=(1, 3)) / jnp.float32(s_total)
    return out.astype(x_ncthw.dtype)


def _reference(x_ncthw, weight, bias):
    """Pure-JAX reference mirroring the PyTorch eval forward."""
    x = jnp.transpose(x_ncthw, (0, 2, 3, 4, 1))              # (N,T,H,W,C)
    y = jnp.einsum("nthwc,kc->nthwk", x, weight,
                   precision=jax.lax.Precision.HIGHEST) + bias
    y = jax.nn.softmax(y, axis=4)
    y = y.mean(axis=(1, 2, 3))
    return y.reshape(y.shape[0], -1)


if __name__ == "__main__":
    NUM_CLASSES = 16

    def _run_case(shape, key):
        n, c, t, h, w = shape
        kx, kw, kb = jax.random.split(key, 3)
        x = jax.random.normal(kx, (n, c, t, h, w), dtype=jnp.float32)
        # PyTorch-default-style Linear init: U[-1/sqrt(dim_in), 1/sqrt(dim_in)].
        bound = 1.0 / (c ** 0.5)
        weight = jax.random.uniform(kw, (NUM_CLASSES, c), jnp.float32, -bound, bound)
        bias = jax.random.uniform(kb, (NUM_CLASSES,), jnp.float32, -bound, bound)

        out = jax.block_until_ready(mkldnn_fcl_forward(x, weight, bias))
        ref = _reference(x, weight, bias)
        assert out.shape == (n, NUM_CLASSES)
        # Tolerance accounts for MXU f32 matmul pass-precision differences vs
        # the XLA reference and the different accumulation order; actual error
        # is typically <1e-5 on probabilities of magnitude ~1/num_classes.
        assert jnp.allclose(out, ref, atol=1e-3, rtol=1e-3), (
            f"mismatch vs reference, max abs diff = {jnp.max(jnp.abs(out - ref))}")

    key = jax.random.PRNGKey(0)
    k1, k2 = jax.random.split(key)
    # Case 1: S = 256 (exact 128-multiple tiling, single tile).
    _run_case((2, 32, 4, 8, 8), k1)
    # Case 2: S = 147 (cdiv grid, masked partial last tile, spatial outer split).
    _run_case((2, 32, 3, 7, 7), k2)

    print("KERNEL_OK")
</pallas_src>

<mosaic_0001>
module attributes {stable_mosaic.version = 11 : i64} {
  func.func @kernel(%arg0: i32, %arg1: i32, %arg2: i32, %arg3: memref<1x32x256xf32, #tpu.memory_space<vmem>>, %arg4: memref<16x32xf32, #tpu.memory_space<vmem>>, %arg5: memref<16x1xf32, #tpu.memory_space<vmem>>, %arg6: memref<1x1x16x128xf32, #tpu.memory_space<vmem>>) attributes {dimension_semantics = [#tpu.dimension_semantics<parallel>, #tpu.dimension_semantics<parallel>, #tpu.dimension_semantics<arbitrary>], iteration_bounds = array<i64: 2, 1, 1>, scalar_prefetch = 0 : i64, scratch_operands = 0 : i64, tpu.core_type = #tpu.core_type<tc>, window_params = [{transform_indices = @transform_0, window_bounds = array<i64: 1, 32, 256>}, {pipeline_mode = #tpu.pipeline_mode<synchronous>, transform_indices = @transform_1, window_bounds = array<i64: 16, 32>}, {pipeline_mode = #tpu.pipeline_mode<synchronous>, transform_indices = @transform_2, window_bounds = array<i64: 16, 1>}, {transform_indices = @transform_3, window_bounds = array<i64: 1, 1, 16, 128>}]} {
    %c0_i32 = arith.constant 0 : i32
    %0 = arith.cmpi eq, %arg2, %c0_i32 : i32
    %1 = arith.extui %0 : i1 to i32
    %c0_i32_0 = arith.constant 0 : i32
    %2 = arith.cmpi ne, %1, %c0_i32_0 : i32
    scf.if %2 {
      %cst_17 = arith.constant 0.000000e+00 : f32
      %29 = vector.broadcast %cst_17 : f32 to vector<16x128xf32>
      %c0_18 = arith.constant 0 : index
      %c0_19 = arith.constant 0 : index
      %c0_20 = arith.constant 0 : index
      %c0_21 = arith.constant 0 : index
      %30 = vector.load %arg6[%c0_18, %c0_19, %c0_20, %c0_21] : memref<1x1x16x128xf32, #tpu.memory_space<vmem>>, vector<1x1x16x128xf32>
      %31 = vector.shape_cast %30 : vector<1x1x16x128xf32> to vector<16x128xf32>
      %32 = vector.shape_cast %29 : vector<16x128xf32> to vector<1x1x16x128xf32>
      tpu.vector_store %arg6[%c0_18, %c0_19, %c0_20, %c0_21], %32 {strides = array<i32>} : memref<1x1x16x128xf32, #tpu.memory_space<vmem>>, vector<1x1x16x128xf32>,
    } else {
    }
    %c0 = arith.constant 0 : index
    %c0_1 = arith.constant 0 : index
    %3 = vector.load %arg4[%c0, %c0_1] : memref<16x32xf32, #tpu.memory_space<vmem>>, vector<16x32xf32>
    %c0_2 = arith.constant 0 : index
    %c0_3 = arith.constant 0 : index
    %c0_4 = arith.constant 0 : index
    %4 = vector.load %arg3[%c0_2, %c0_3, %c0_4] : memref<1x32x256xf32, #tpu.memory_space<vmem>>, vector<1x32x256xf32>
    %5 = vector.shape_cast %4 : vector<1x32x256xf32> to vector<32x256xf32>
    %cst = arith.constant dense<0.000000e+00> : vector<16x256xf32>
    %6 = tpu.matmul %3, %5, %cst {dimension_numbers = #tpu.dot_dimension_numbers<[1], [0], [0], [1], [0, 0, 1, 1], [], []>} : vector<16x32xf32>, vector<32x256xf32>, vector<16x256xf32> -> vector<16x256xf32>
    %c0_5 = arith.constant 0 : index
    %c0_6 = arith.constant 0 : index
    %7 = vector.load %arg5[%c0_5, %c0_6] : memref<16x1xf32, #tpu.memory_space<vmem>>, vector<16x1xf32>
    %8 = vector.broadcast %7 : vector<16x1xf32> to vector<16x256xf32>
    %9 = arith.addf %6, %8 : vector<16x256xf32>
    %cst_7 = arith.constant dense<0xFF800000> : vector<256xf32>
    %10 = vector.multi_reduction <maximumf>, %9, %cst_7 [0] : vector<16x256xf32> to vector<256xf32>
    %11 = vector.shape_cast %10 : vector<256xf32> to vector<1x256xf32>
    %12 = vector.broadcast %11 : vector<1x256xf32> to vector<16x256xf32>
    %13 = arith.subf %9, %12 : vector<16x256xf32>
    %14 = math.exp %13 : vector<16x256xf32>
    %cst_8 = arith.constant dense<0.000000e+00> : vector<256xf32>
    %15 = vector.multi_reduction <add>, %14, %cst_8 [0] : vector<16x256xf32> to vector<256xf32>
    %16 = vector.shape_cast %15 : vector<256xf32> to vector<1x256xf32>
    %17 = tpu.reciprocal %16 : vector<1x256xf32> -> vector<1x256xf32>
    %18 = vector.broadcast %17 : vector<1x256xf32> to vector<16x256xf32>
    %19 = arith.mulf %14, %18 : vector<16x256xf32>
    %20 = vector.extract_strided_slice %19 {offsets = [0, 0], sizes = [16, 128], strides = [1, 1]} : vector<16x256xf32> to vector<16x128xf32>
    %21 = vector.extract_strided_slice %19 {offsets = [0, 128], sizes = [16, 128], strides = [1, 1]} : vector<16x256xf32> to vector<16x128xf32>
    %22 = arith.addf %20, %21 : vector<16x128xf32>
    %c0_9 = arith.constant 0 : index
    %c0_10 = arith.constant 0 : index
    %c0_11 = arith.constant 0 : index
    %c0_12 = arith.constant 0 : index
    %23 = vector.load %arg6[%c0_9, %c0_10, %c0_11, %c0_12] : memref<1x1x16x128xf32, #tpu.memory_space<vmem>>, vector<1x1x16x128xf32>
    %24 = vector.shape_cast %23 : vector<1x1x16x128xf32> to vector<16x128xf32>
    %25 = arith.addf %24, %22 : vector<16x128xf32>
    %c0_13 = arith.constant 0 : index
    %c0_14 = arith.constant 0 : index
    %c0_15 = arith.constant 0 : index
    %c0_16 = arith.constant 0 : index
    %26 = vector.load %arg6[%c0_13, %c0_14, %c0_15, %c0_16] : memref<1x1x16x128xf32, #tpu.memory_space<vmem>>, vector<1x1x16x128xf32>
    %27 = vector.shape_cast %26 : vector<1x1x16x128xf32> to vector<16x128xf32>
    %28 = vector.shape_cast %25 : vector<16x128xf32> to vector<1x1x16x128xf32>
    tpu.vector_store %arg6[%c0_13, %c0_14, %c0_15, %c0_16], %28 {strides = array<i32>} : memref<1x1x16x128xf32, #tpu.memory_space<vmem>>, vector<1x1x16x128xf32>,
    return
  }
  func.func @transform_0(%arg0: i32, %arg1: i32, %arg2: i32) -> (i32, i32, i32) {
    %c1_i32 = arith.constant 1 : i32
    %0 = arith.muli %arg1, %c1_i32 : i32
    %1 = arith.addi %0, %arg2 : i32
    %c0_i32 = arith.constant 0 : i32
    %2 = arith.minsi %1, %c0_i32 : i32
    %c0_i32_0 = arith.constant 0 : i32
    %c0_i32_1 = arith.constant 0 : i32
    return %arg0, %c0_i32_0, %2 : i32, i32, i32
  }
  func.func @transform_1(%arg0: i32, %arg1: i32, %arg2: i32) -> (i32, i32) {
    %c0_i32 = arith.constant 0 : i32
    %c0_i32_0 = arith.constant 0 : i32
    %c0_i32_1 = arith.constant 0 : i32
    return %c0_i32, %c0_i32_0 : i32, i32
  }
  func.func @transform_2(%arg0: i32, %arg1: i32, %arg2: i32) -> (i32, i32) {
    %c0_i32 = arith.constant 0 : i32
    %c0_i32_0 = arith.constant 0 : i32
    %c0_i32_1 = arith.constant 0 : i32
    return %c0_i32, %c0_i32_0 : i32, i32
  }
  func.func @transform_3(%arg0: i32, %arg1: i32, %arg2: i32) -> (i32, i32, i32, i32) {
    %c0_i32 = arith.constant 0 : i32
    %c0_i32_0 = arith.constant 0 : i32
    %c0_i32_1 = arith.constant 0 : i32
    return %arg0, %arg1, %c0_i32, %c0_i32_0 : i32, i32, i32, i32
  }
}

</mosaic_0001>

<bundles_post_ra>
// kernel: tpu_custom_call.1
= control target key start
LH: loop header
LB: loop body
LE: loop exit
PB: predicated region body
PF: predicated region fallthrough
CT: control target
= control target key end

     0   :  { %8 = vsyncpa [#allocation3], 0  ;;  %s880_s0 = inlined_call_operand.hbm [shape: f32[2,32,256], index: 0, kind: input, shape index: {}]   ;;  %s881_s1 = inlined_call_operand.vmem [shape: f32[16,32], index: 1, kind: input, shape index: {}]   ;;  %s882_s2 = inlined_call_operand.vmem [shape: f32[16,1], index: 2, kind: input, shape index: {}]   ;;  %s883_s3 = inlined_call_operand.hbm [shape: f32[2,1,16,128], index: 3, kind: output, shape index: {}]  }
   0x1   :  { %10 = vsyncpa [#allocation3 + $0x1], 0 }
   0x2   :  { %11 = vsyncpa [#allocation4], 0 }
   0x3   :  { %13 = vsyncpa [#allocation4 + $0x1], 0  ;;  %s747_s12 = smov 0   ;;  %s749_s13 = smov 0  }
   0x4   :  { %s751_s14 = smov 0   ;;  %s753_s15 = smov 0  }
   0x5   :  { %s755_s16 = smov 0   ;;  %s757_s17 = smov 0  }
   0x6 LB: > { %s498_s18 = sadd.s32 4294967295, %s720_s17   ;;  %s499_s19 = sadd.s32 4294967294, %s720_s17   ;;  %s720_s17 = sphi %s757_s17, %s19_s17   ;;  %s716_s16 = sphi %s755_s16, %s892_s16   ;;  %s712_s15 = sphi %s753_s15, %s891_s15   ;;  %s708_s14 = sphi %s751_s14, %s890_s14   ;;  %s704_s13 = sphi %s749_s13, %s889_s13   ;;  %s700_s12 = sphi %s747_s12, %s888_s12  }
   0x7   : > { %s38_s20 = sadd.s32 1, %s716_s16  ;;  %s53_s21 = sadd.s32 1, %s708_s14 }
   0x8   : > { %p40_p0 = scmp.ge.s32.totalorder %s38_s20, 2  ;;  %p60_p1 = scmp.ne.s32.totalorder %s708_s14, %s704_s13 }
   0x9   : > { %p61_p2 = scmp.eq.s32.totalorder %s720_s17, 0  ;;  %p66_p3 = scmp.ne.s32.totalorder %s704_s13, %s700_s12 }
   0xa   : > { %s894_s20 = smov (%p40_p0, %s38_s20), 0  ;;  %p67_p5 = scmp.eq.s32.totalorder %s498_s18, 0 }
   0xb   : > { %p788_p4 = por %p61_p2, %p60_p1  ;;  %s48_s23 = ssub.s32 %s716_s16, %s894_s20 }
   0xc   : > { %p134_p6 = scmp.eq.s32.totalorder %s498_s18, 1  ;;  %p51_p7 = scmp.eq.s32.totalorder %s48_s23, 0 }
   0xd   : > { %p794_p8 = por %p67_p5, %p66_p3  ;;  %p140_p10 = scmp.eq.s32.totalorder %s499_s19, 1 }
   0xe   : > { %p798_p9 = por %p134_p6, %p60_p1  ;;  %p501_p12 = scmp.ge.s32.totalorder %s720_s17, 2 }
   0xf   : > { %s803_s26 = scalar_select %p51_p7, %s708_s14, %s53_s21  }
  0x10   : > { %p805_p11 = por %p140_p10, %p66_p3  ;;  %p539_p13 = scmp.lt.s32.totalorder %s720_s17, 2 }
  0x11   : > { %s166_s28 = sand.u32 1, %s708_s14   ;;  %s517_s30 = sshll.u32 %s716_s16, 6 }
  0x12   : > { %s502_s29 = sshll.u32 %s166_s28, 6  ;;  %s180_s6 = scalar_lea.hbm %s880_s0, %s517_s30 }
  0x13   : > { %s170_s7 = scalar_lea.vmem [#allocation2], %s502_s29  ;;  %s181_s9 = sshll.u32 %s180_s6, 4  ;;  %s182_s9 = int_to_ptr.hbm [resolvable:$true] %s181_s9 }
  0x14   : > { %s183_s8 = sshll.u32 %s170_s7, 4  ;;  %p532_p0 = pnand %p539_p13, %p788_p4  ;;  %s184_s8 = int_to_ptr.vmem [resolvable:$true] %s183_s8 }
  0x15   : > { %p505_p1 = scmp.ge.s32.totalorder %s720_s17, 1  ;;  %s167_s10 = scalar_lea.sflag [#allocation3], %s166_s28 }
  0x16   : > { %s722_s11 = smov 256   ;;  %s723_s18 = smov 16  }
  0x17   : > { %534 = dma.hbm_to_vmem [thread:$0]  (!%p532_p0), %s182_s9, 1024, %s184_s8, %s167_s10, %s722_s11, %s722_s11, %s723_s18  }
  0x18   : > { %p191_p2 = scmp.lt.s32.totalorder %s720_s17, 3 }
  0x1a   : > { %p192_p3 = pnand %p505_p1, %p191_p2 }
  0x1b   : > { %s821_s19 = sand.u32 (!%p192_p3), 1, %s704_s13  }
  0x1c   : > { %195 = sbr.rel (%p192_p3) target bundleno = 246 (0xf6), region = 32  ;;  %s506_s21 = sshll.u32 (!%p192_p3), %s821_s19, 6 }
  0x1d   : > { %s198_s23 = scalar_lea.sflag (!%p192_p3), [#allocation3], %s821_s19  ;;  %s201_s29 = scalar_lea.vmem (!%p192_p3), [#allocation2], %s506_s21 }
  0x21   : > { %691 = dma.done.wait (%p794_p8), %s198_s23, 1024  }
  0x22   : > { %693 = vsyncadd (%p794_p8), %s198_s23, 4294966272  ;;  %v724_v0 = vmov 0   ;;  %v243_v1 = vld [vmem:[%s201_s29 + $0x30] sm:$0xff]  ;;  %v244_v2 = vld [vmem:[%s201_s29 + $0x38] sm:$0xff]  ;;  %vm257_vm0 = vcmask 261120   ;;  %s507_s8 = sshll.u32 %s821_s19, 4 }
  0x23   : > { %595 = vset.pattern.permute.xlu0 %v724_v0  ;;  %v241_v3 = vld [vmem:[%s201_s29 + $0x20] sm:$0xff]  ;;  %276 = vmatpush.msra.mxu0 %v243_v1  ;;  %v242_v4 = vld [vmem:[%s201_s29 + $0x28] sm:$0xff]  ;;  %v239_v5 = vld [vmem:[%s201_s29 + $0x10] sm:$0xff]  ;;  %s518_s9 = sshll.u32 %s712_s15, 4  ;;  %s224_s21 = scalar_lea.vmem [#allocation5], %s507_s8 }
  0x24   : > { %519 = vmatpush.msra.mxu2 %v243_v1  ;;  %299 = vmatpush.msra.mxu1 %v244_v2  ;;  %v240_v6 = vld [vmem:[%s201_s29 + $0x18] sm:$0xff]  ;;  %v237_v7 = vld [vmem:[%s201_s29] sm:$0xff]  ;;  %v238_v8 = vld [vmem:[%s201_s29 + $0x8] sm:$0xff]  ;;  %s404_s18 = scalar_lea.hbm %s883_s3, %s518_s9  ;;  %s405_s15 = sshll.u32 %s224_s21, 4  ;;  %s406_s15 = int_to_ptr.vmem [resolvable:$true] %s405_s15 }
  0x25   : > { %523 = vmatpush.msra.mxu3 %v244_v2  ;;  %277 = vmatpush.msra.mxu0 %v241_v3  ;;  %v235_v9 = vld [vmem:[%s881_s1] sm:$0xff]  ;;  %v236_v10 = vld [vmem:[%s881_s1 + $0x8] sm:$0xff]  ;;  %s407_s23 = sshll.u32 %s404_s18, 4  ;;  %s391_s29 = scalar_lea.sflag [#allocation4], %s821_s19  ;;  %s408_s23 = int_to_ptr.hbm [resolvable:$true] %s407_s23 }
  0x26   : > { %520 = vmatpush.msra.mxu2 %v241_v3  ;;  %300 = vmatpush.msra.mxu1 %v242_v4  ;;  %v245_v11 = vld [vmem:[%s882_s2] sm:$0xff]  ;;  %v246_v12 = vld [vmem:[%s882_s2 + $0x8] sm:$0xff]  ;;  %s652_s22 = sshra.s32 %s408_s23, 4  ;;  %s658_s4 = scalar_lea.hbm %s883_s3, 32  ;;  %s653_s22 = int_to_ptr.hbm [resolvable:$true] %s652_s22 }
  0x27   : > { %524 = vmatpush.msra.mxu3 %v242_v4  ;;  %278 = vmatpush.msra.mxu0 %v239_v5  ;;  %s654_s24 = scalar_lea.hbm %s653_s22, 16  ;;  %p659_p7 = scmp.lt.s32.totalorder %s653_s22, %s883_s3 }
  0x28   : > { %521 = vmatpush.msra.mxu2 %v239_v5  ;;  %301 = vmatpush.msra.mxu1 %v240_v6  ;;  %p655_p4 = scmp.ne.s32.totalorder %s653_s22, %s654_s24  ;;  %p660_p8 = scmp.lt.s32.totalorder %s658_s4, %s654_s24 }
  0x29   : > { %525 = vmatpush.msra.mxu3 %v240_v6  ;;  %279 = vmatpush.msra.mxu0 %v237_v7 }
  0x2a   : > { %522 = vmatpush.msra.mxu2 %v237_v7  ;;  %302 = vmatpush.msra.mxu1 %v238_v8  ;;  %p656_p5 = pnand %p655_p4, %p798_p9  ;;  %p661_p10 = por %p660_p8, %p659_p7 }
  0x2b   : > { %526 = vmatpush.msra.mxu3 %v238_v8  ;;  %508 = vmatmul.msk.f32.vlgmr.msra.gmra.mxu0 %vm257_vm0, %v235_v9 }
  0x2c   : > { %509 = vmatmul.msk.f32.vlgmr.msra.gmra.mxu2 %vm257_vm0, %v236_v10  ;;  %510 = vmatmul.msk.f32.vlgmr.msra.gmra.mxu1 %vm257_vm0, %v235_v9  ;;  %p657_p6 = pneg %p656_p5 }
  0x2d   : > { %511 = vmatmul.msk.f32.vlgmr.msra.gmra.mxu3 %vm257_vm0, %v236_v10  ;;  %249 = vperm.xlu0 %595, %v245_v11  }
  0x2e   : > { %p662_p13 = pnand %p661_p10, %p657_p6 }
  0x35   : > { %254 = vperm.xlu0 %595, %v246_v12  }
  0x9f   : > { %v250_v13 = vpop.permute.xlu0 %249 }
  0xa7   : > { %v255_v16 = vpop.permute.xlu0 %254 }
  0xa8   : > { %v281_v14 = vpop.f32.mrf.mxu0 }
  0xa9   : > { %v304_v15 = vpop.f32.mrf.mxu1  ;;  %v282_v18 = vadd.f32 %v281_v14, %v250_v13 }
  0xaa   : > { %v305_v21 = vadd.f32 %v304_v15, %v250_v13 }
  0xaf   : > { %v284_v17 = vpop.f32.mrf.mxu2 }
  0xb0   : > { %v285_v19 = vadd.f32 %v284_v17, %v255_v16  ;;  %v307_v20 = vpop.f32.mrf.mxu3 }
  0xb1   : > { %v308_v22 = vadd.f32 %v307_v20, %v255_v16 }
  0xb2   : > { %v310_v23 = vmax.f32 %v282_v18, %v285_v19 }
  0xb3   : > { %v317_v24 = vmax.f32 %v305_v21, %v308_v22 }
  0xb4   : > { %v311_v25 = vrot.slane %v310_v23, 4 }
  0xb5   : > { %v318_v26 = vrot.slane %v317_v24, 4 }
  0xb6   : > { %v312_v27 = vmax.f32 %v310_v23, %v311_v25 }
  0xb7   : > { %v319_v28 = vmax.f32 %v317_v24, %v318_v26 }
  0xb8   : > { %v313_v29 = vrot.slane %v312_v27, 2 }
  0xb9   : > { %v320_v30 = vrot.slane %v319_v28, 2 }
  0xba   : > { %v314_v31 = vmax.f32 %v312_v27, %v313_v29 }
  0xbb   : > { %v321_v32 = vmax.f32 %v319_v28, %v320_v30 }
  0xbc   : > { %v315_v33 = vrot.slane %v314_v31, 1 }
  0xbd   : > { %v322_v34 = vrot.slane %v321_v32, 1 }
  0xbe   : > { %v316_v35 = vmax.f32 %v314_v31, %v315_v33 }
  0xbf   : > { %v323_v36 = vmax.f32 %v321_v32, %v322_v34 }
  0xc0   : > { %v324_v37 = vsub.f32 %v282_v18, %v316_v35  ;;  %v326_v38 = vsub.f32 %v285_v19, %v316_v35 }
  0xc1   : > { %v325_v39 = vsub.f32 %v305_v21, %v323_v36  ;;  %v327_v40 = vsub.f32 %v308_v22, %v323_v36 }
  0xc2   : > { %v328_v41 = vmul.f32 1.442695, %v324_v37  ;;  %v332_v42 = vmul.f32 1.442695, %v326_v38 }
  0xc3   : > { %v330_v43 = vmul.f32 1.442695, %v325_v39  ;;  %v334_v44 = vmul.f32 1.442695, %v327_v40 }
  0xc4   : > { %596 = vpow2.f32 %v328_v41 }
  0xc5   : > { %598 = vpow2.f32 %v332_v42 }
  0xc6   : > { %600 = vpow2.f32 %v330_v43 }
  0xc7   : > { %602 = vpow2.f32 %v334_v44 }
  0xca   : > { %v597_v45 = vpop.eup %596 }
  0xcb   : > { %v599_v46 = vpop.eup %598 }
  0xcc   : > { %v601_v47 = vpop.eup %600  ;;  %v336_v48 = vadd.f32 %v599_v46, %v597_v45 }
  0xcd   : > { %v603_v49 = vpop.eup %602 }
  0xce   : > { %v337_v50 = vrot.slane %v336_v48, 4  ;;  %v343_v51 = vadd.f32 %v603_v49, %v601_v47 }
  0xd0   : > { %v338_v52 = vadd.f32 %v337_v50, %v336_v48  ;;  %v344_v53 = vrot.slane %v343_v51, 4 }
  0xd2   : > { %v339_v54 = vrot.slane %v338_v52, 2  ;;  %v345_v55 = vadd.f32 %v344_v53, %v343_v51 }
  0xd4   : > { %v340_v56 = vadd.f32 %v339_v54, %v338_v52  ;;  %v346_v57 = vrot.slane %v345_v55, 2 }
  0xd6   : > { %v341_v58 = vrot.slane %v340_v56, 1  ;;  %v347_v59 = vadd.f32 %v346_v57, %v345_v55 }
  0xd8   : > { %v342_v60 = vadd.f32 %v341_v58, %v340_v56  ;;  %v348_v61 = vrot.slane %v347_v59, 1 }
  0xda   : > { %604 = vrcp.f32 %v342_v60  ;;  %v349_v62 = vadd.f32 %v348_v61, %v347_v59  ;;  %v361_v3 = vand.u32 2147483648, %v342_v60  ;;  %v359_v6 = vand.u32 2147483647, %v342_v60 }
  0xdb   : > { %vm355_vm2 = vweird.f32 %v342_v60 }
  0xdc   : > { %606 = vrcp.f32 %v349_v62  ;;  %v375_v9 = vand.u32 2147483648, %v349_v62  ;;  %v362_v10 = vor.u32 1.1754944e-38, %v361_v3  ;;  %v373_v12 = vand.u32 2147483647, %v349_v62 }
  0xdd   : > { %vm360_vm5 = vcmp.eq.f32.partialorder %v359_v6, 8.507059e+37  ;;  %vm369_vm6 = vweird.f32 %v349_v62 }
  0xde   : > { %v376_v16 = vor.u32 1.1754944e-38, %v375_v9  ;;  %vm374_vm8 = vcmp.eq.f32.partialorder %v373_v12, 8.507059e+37 }
  0xe0   : > { %v605_v63 = vpop.eup %604 }
  0xe1   : > { %v351_v0 = vmul.f32 %v605_v63, %v342_v60  ;;  %vm356_vm1 = vweird.f32 %v605_v63 }
  0xe2   : > { %v607_v1 = vpop.eup %606  ;;  %vm357_vm3 = vmor %vm355_vm2, %vm356_vm1 }
  0xe3   : > { %v352_v2 = vsub.f32 1.0, %v351_v0  ;;  %v365_v4 = vmul.f32 %v607_v1, %v349_v62  ;;  %vm370_vm4 = vweird.f32 %v607_v1 }
  0xe4   : > { %vm371_vm7 = vmor %vm369_vm6, %vm370_vm4 }
  0xe5   : > { %v353_v5 = vmul.f32 %v605_v63, %v352_v2  ;;  %v366_v7 = vsub.f32 1.0, %v365_v4 }
  0xe7   : > { %v354_v8 = vadd.f32 %v605_v63, %v353_v5  ;;  %v367_v11 = vmul.f32 %v607_v1, %v366_v7 }
  0xe9   : > { %v358_v13 = vsel %vm357_vm3, %v605_v63, %v354_v8  ;;  %v368_v15 = vadd.f32 %v607_v1, %v367_v11 }
  0xea   : > { %v363_v14 = vsel %vm360_vm5, %v362_v10, %v358_v13 }
  0xeb   : > { %v378_v17 = vmul.f32 %v597_v45, %v363_v14  ;;  %v380_v18 = vmul.f32 %v599_v46, %v363_v14  ;;  %v372_v19 = vsel %vm371_vm7, %v607_v1, %v368_v15 }
  0xec   : > { %v377_v20 = vsel %vm374_vm8, %v376_v16, %v372_v19 }
  0xed   : > { %v379_v21 = vmul.f32 %v601_v47, %v377_v20  ;;  %v381_v22 = vmul.f32 %v603_v49, %v377_v20 }
  0xef   : > { %v382_v23 = vadd.f32 %v379_v21, %v378_v17  ;;  %v383_v24 = vadd.f32 %v381_v22, %v380_v18 }
  0xf1   : > { %388 = vst [vmem:[%s224_s21] sm:$0xff] %v382_v23 }
  0xf2   : > { %389 = vst [vmem:[%s224_s21 + $0x8] sm:$0xff] %v383_v24 }
  0xf3   : > { %665 = shalt.err (!%p662_p13)
}
  0xf4   : > { %s725_s19 = smov 128   ;;  %s726_s7 = smov 8  }
  0xf5   : > { %529 = dma.vmem_to_hbm [thread:$0]  (%p798_p9), %s406_s15, 256, %s408_s23, %s391_s29, %s725_s19, %s725_s19, %s726_s7  }
  0xf6 PF: > { %s422_s8 = sand.u32 1, %s700_s12   ;;  %p536_p0 = pnand %p501_p12, %p805_p11 }
  0xf7   : > { %s423_s9 = scalar_lea.sflag [#allocation4], %s422_s8 }
  0xf8   : > { %p537_p1 = pneg %p536_p0 }
  0xfa   : > { %695 = dma.done.wait (%p537_p1), %s423_s9, 256  }
  0xfb   : > { %697 = vsyncadd (%p537_p1), %s423_s9, 4294967040  ;;  %s19_s17 = sadd.s32 1, %s720_s17   ;;  %s888_s12 = smov %s704_s13 }
  0xfc   : > { %p16_p2 = scmp.ge.s32.totalorder %s19_s17, 4   ;;  %s889_s13 = smov %s708_s14 }
  0xfd   : > { %s890_s14 = smov %s803_s26  ;;  %s891_s15 = smov %s716_s16 }
  0xfe   : > { %s892_s16 = smov %s894_s20  ;;  %18 = sbr.rel (!%p16_p2) target bundleno = 6 (0x6), region = 81 }
 0x103   :  { %429 = vsyncpa [#allocation3], 1 }
 0x104   :  { %431 = vsyncpa [#allocation3 + $0x1], 1 }
 0x105   :  { %432 = vsyncpa [#allocation4], 1 }
 0x106   :  { %434 = vsyncpa [#allocation4 + $0x1], 1 }

</bundles_post_ra>
